<compile_context>
chip_gen: v5e
topology: v5e:2x2
jax: 0.10.0
libtpu: 0.0.40
codegen_flags: <defaults>
</compile_context>

<pallas_src>
import jax
import jax.numpy as jnp
from jax.experimental import pallas as pl
from jax.experimental.pallas import tpu as pltpu


def _logreg_kernel(w_ref, b_ref, xt_ref, o_ref):
    # w_ref : (1, 2)    SMEM scalar weights [w0, w1]
    # b_ref : (1, 1)    SMEM scalar bias
    # xt_ref: (2, TILE) VMEM  (features on sublanes, samples on lanes)
    # o_ref : (1, TILE) VMEM  (lane-dense output)
    w0 = w_ref[0, 0]
    w1 = w_ref[0, 1]
    b = b_ref[0, 0]
    # Two VPU FMAs replace the MXU matmul (K=2, out_features=1).
    z = xt_ref[0:1, :] * w0 + xt_ref[1:2, :] * w1 + b
    # sigmoid(z) = 1 / (1 + exp(-z)) : exp and approx-reciprocal both issue on
    # the otherwise-idle EUP slot.
    o_ref[...] = pl.reciprocal(1.0 + jnp.exp(-z), approx=True).astype(o_ref.dtype)


def logistic_regression_forward(x, weight, bias, *, tile_lanes=512):
    """Pallas equivalent of: sigmoid(x @ weight.T + bias).

    x:      (N, 2)  float32
    weight: (1, 2)  float32   (torch.nn.Linear(2, 1).weight layout)
    bias:   (1,)    float32
    returns (N, 1)  float32
    """
    n, k = x.shape
    assert k == 2, "kernel is specialized for in_features=2"
    assert weight.shape == (1, 2) and bias.shape == (1,)

    # Lane tile: multiple of 128, capped so tiny N does not over-pad.
    lane = min(tile_lanes, pl.cdiv(n, 128) * 128)
    n_pad = pl.cdiv(n, lane) * lane

    # Lane-dense layout: samples on the 128-lane axis, features on sublanes.
    xt = jnp.pad(x.T.astype(jnp.float32), ((0, 0), (0, n_pad - n)))
    w2d = weight.reshape(1, 2).astype(jnp.float32)   # SMEM scalars
    b2d = bias.reshape(1, 1).astype(jnp.float32)     # SMEM scalar

    out = pl.pallas_call(
        _logreg_kernel,
        out_shape=jax.ShapeDtypeStruct((1, n_pad), x.dtype),
        grid=(n_pad // lane,),
        in_specs=[
            pl.BlockSpec((1, 2), lambda i: (0, 0),
                         memory_space=pltpu.MemorySpace.SMEM),
            pl.BlockSpec((1, 1), lambda i: (0, 0),
                         memory_space=pltpu.MemorySpace.SMEM),
            pl.BlockSpec((2, lane), lambda i: (0, i)),
        ],
        out_specs=pl.BlockSpec((1, lane), lambda i: (0, i)),
        compiler_params=pltpu.CompilerParams(
            dimension_semantics=("parallel",)),
    )(w2d, b2d, xt)

    # Free layout fixup outside the kernel: back to the module's (N, 1) shape.
    return out[0, :n].reshape(n, 1)


if __name__ == "__main__":
    key = jax.random.PRNGKey(0)
    k_x, k_w, k_b = jax.random.split(key, 3)

    # Synthetic input mimicking the module's data: 100 samples, 2 features
    # (the torch script builds x = distrib.rsample().T of shape (100, 2)).
    n, in_features, out_features = 100, 2, 1
    x = jax.random.normal(k_x, (n, in_features), dtype=jnp.float32) + 2.0

    # Deterministic parameter init matching torch.nn.Linear default:
    # uniform(-1/sqrt(fan_in), 1/sqrt(fan_in)) with fan_in = 2.
    bound = 1.0 / jnp.sqrt(jnp.float32(in_features))
    weight = jax.random.uniform(k_w, (out_features, in_features),
                                minval=-bound, maxval=bound,
                                dtype=jnp.float32)
    bias = jax.random.uniform(k_b, (out_features,),
                              minval=-bound, maxval=bound,
                              dtype=jnp.float32)

    out = logistic_regression_forward(x, weight, bias)
    out = jax.block_until_ready(out)

    # Reference check in plain JAX (approx EUP reciprocal -> ~1e-4 abs error).
    ref = jax.nn.sigmoid(x @ weight.T + bias)
    assert out.shape == (n, 1), out.shape
    assert jnp.allclose(out, ref, atol=1e-3, rtol=1e-3), "mismatch vs reference"

    print("KERNEL_OK")
</pallas_src>

<mosaic_0001>
module attributes {stable_mosaic.version = 11 : i64} {
  func.func @_logreg_kernel(%arg0: i32, %arg1: memref<1x2xf32, #tpu.memory_space<smem>>, %arg2: memref<1x1xf32, #tpu.memory_space<smem>>, %arg3: memref<2x128xf32, #tpu.memory_space<vmem>>, %arg4: memref<1x128xf32, #tpu.memory_space<vmem>>) attributes {dimension_semantics = [#tpu.dimension_semantics<parallel>], iteration_bounds = array<i64: 1>, scalar_prefetch = 0 : i64, scratch_operands = 0 : i64, tpu.core_type = #tpu.core_type<tc>, window_params = [{transform_indices = @transform_0, window_bounds = array<i64: 1, 2>}, {transform_indices = @transform_1, window_bounds = array<i64: 1, 1>}, {transform_indices = @transform_2, window_bounds = array<i64: 2, 128>}, {transform_indices = @transform_3, window_bounds = array<i64: 1, 128>}]} {
    %c0 = arith.constant 0 : index
    %c0_0 = arith.constant 0 : index
    %0 = memref.load %arg1[%c0, %c0_0] : memref<1x2xf32, #tpu.memory_space<smem>>
    %c0_1 = arith.constant 0 : index
    %c1 = arith.constant 1 : index
    %1 = memref.load %arg1[%c0_1, %c1] : memref<1x2xf32, #tpu.memory_space<smem>>
    %c0_2 = arith.constant 0 : index
    %c0_3 = arith.constant 0 : index
    %2 = memref.load %arg2[%c0_2, %c0_3] : memref<1x1xf32, #tpu.memory_space<smem>>
    %c0_4 = arith.constant 0 : index
    %c0_5 = arith.constant 0 : index
    %3 = vector.load %arg3[%c0_4, %c0_5] : memref<2x128xf32, #tpu.memory_space<vmem>>, vector<1x128xf32>
    %4 = vector.broadcast %0 : f32 to vector<1x128xf32>
    %5 = arith.mulf %3, %4 : vector<1x128xf32>
    %c1_6 = arith.constant 1 : index
    %c0_7 = arith.constant 0 : index
    %6 = vector.load %arg3[%c1_6, %c0_7] : memref<2x128xf32, #tpu.memory_space<vmem>>, vector<1x128xf32>
    %7 = vector.broadcast %1 : f32 to vector<1x128xf32>
    %8 = arith.mulf %6, %7 : vector<1x128xf32>
    %9 = arith.addf %5, %8 : vector<1x128xf32>
    %10 = vector.broadcast %2 : f32 to vector<1x128xf32>
    %11 = arith.addf %9, %10 : vector<1x128xf32>
    %cst = arith.constant 0.000000e+00 : f32
    %12 = vector.broadcast %cst : f32 to vector<1x128xf32>
    %13 = arith.subf %12, %11 : vector<1x128xf32>
    %14 = math.exp %13 : vector<1x128xf32>
    %cst_8 = arith.constant 1.000000e+00 : f32
    %15 = vector.broadcast %cst_8 : f32 to vector<1x128xf32>
    %16 = arith.addf %15, %14 : vector<1x128xf32>
    %17 = tpu.reciprocal %16 {approx = true} : vector<1x128xf32> -> vector<1x128xf32>
    %c0_9 = arith.constant 0 : index
    %c0_10 = arith.constant 0 : index
    %18 = vector.load %arg4[%c0_9, %c0_10] : memref<1x128xf32, #tpu.memory_space<vmem>>, vector<1x128xf32>
    tpu.vector_store %arg4[%c0_9, %c0_10], %17 {strides = array<i32>} : memref<1x128xf32, #tpu.memory_space<vmem>>, vector<1x128xf32>,
    return
  }
  func.func @transform_0(%arg0: i32) -> (i32, i32) {
    %c0_i32 = arith.constant 0 : i32
    %c0_i32_0 = arith.constant 0 : i32
    %c0_i32_1 = arith.constant 0 : i32
    return %c0_i32, %c0_i32_0 : i32, i32
  }
  func.func @transform_1(%arg0: i32) -> (i32, i32) {
    %c0_i32 = arith.constant 0 : i32
    %c0_i32_0 = arith.constant 0 : i32
    %c0_i32_1 = arith.constant 0 : i32
    return %c0_i32, %c0_i32_0 : i32, i32
  }
  func.func @transform_2(%arg0: i32) -> (i32, i32) {
    %c0_i32 = arith.constant 0 : i32
    %c0_i32_0 = arith.constant 0 : i32
    return %c0_i32, %arg0 : i32, i32
  }
  func.func @transform_3(%arg0: i32) -> (i32, i32) {
    %c0_i32 = arith.constant 0 : i32
    %c0_i32_0 = arith.constant 0 : i32
    return %c0_i32, %arg0 : i32, i32
  }
}

</mosaic_0001>

<bundles_post_ra>
// kernel: tpu_custom_call.1
= control target key start
LH: loop header
LB: loop body
LE: loop exit
PB: predicated region body
PF: predicated region fallthrough
CT: control target
= control target key end

     0   :  { %9 = vsyncpa [#allocation5], 0  ;;  %s148_s0 = inlined_call_operand.hbm [shape: f32[1,2], index: 0, kind: input, shape index: {}]   ;;  %s149_s1 = inlined_call_operand.<no memory space> [shape: f32[1,1], index: 1, kind: input, shape index: {}]   ;;  %s150_s2 = inlined_call_operand.vmem [shape: f32[2,128], index: 2, kind: input, shape index: {}]   ;;  %s151_s3 = inlined_call_operand.hbm [shape: f32[1,128], index: 3, kind: output, shape index: {}]  }
   0x1   :  { %10 = vsyncpa [#allocation4], 0  ;;  %s16_s14 = sshll.u32 %s148_s0, 4  ;;  %s111_s15 = smov [#allocation3]   ;;  %s17_s14 = int_to_ptr.hbm [resolvable:$true] %s16_s14 }
   0x2   :  { %19 = dma.hbm_to_smem %s17_s14, 16, %s111_s15, [#allocation5]  }
   0x3   :  { %107 = dma.done.wait [#allocation5], 16  }
   0x4   :  { %108 = vsyncadd [#allocation5], 4294967280 }
   0x5   :  { %28 = sfence }
   0x6   :  { %s29_s16 = sld [smem:[#allocation3]]  ;;  %v32_v0 = vld [vmem:[%s150_s2] sm:$0x1]  ;;  %v35_v1 = vld [vmem:[%s150_s2 + $0x1] sm:$0x1]  ;;  %v39_v6 = vstv %s149_s1  ;;  %s112_s23 = smov [#allocation6]  }
   0x7   :  { %s64_s17 = sld [smem:[#allocation3 + $0x1]]  ;;  %s52_s24 = sshll.u32 %s112_s23, 4  ;;  %s53_s24 = int_to_ptr.vmem [resolvable:$true] %s52_s24 }
   0x8   :  { %s54_s26 = sshll.u32 %s151_s3, 4  ;;  %s55_s26 = int_to_ptr.hbm [resolvable:$true] %s54_s26 }
   0xc   :  { %v33_v2 = vstv %s29_s16 }
   0xd   :  { %v34_v3 = vmul.f32 %v33_v2, %v32_v0  ;;  %v36_v4 = vstv %s64_s17 }
   0xe   :  { %v37_v5 = vmul.f32 %v36_v4, %v35_v1 }
  0x10   :  { %v38_v7 = vadd.f32 %v37_v5, %v34_v3 }
  0x12   :  { %v40_v8 = vadd.f32 %v39_v6, %v38_v7 }
  0x14   :  { %v41_v9 = vsub.f32 0.0, %v40_v8 }
  0x16   :  { %v42_v10 = vmul.f32 1.442695, %v41_v9 }
  0x18   :  { %67 = vpow2.f32 %v42_v10 }
  0x1e   :  { %v68_v11 = vpop.eup %67 }
  0x1f   :  { %v44_v12 = vadd.f32 1.0, %v68_v11 }
  0x21   :  { %69 = vrcp.f32 %v44_v12 }
  0x27   :  { %v70_v13 = vpop.eup %69 }
  0x28   :  { %46 = vst [vmem:[#allocation6] sm:$0x1] %v70_v13 }
  0x29   :  { %57 = dma.vmem_to_hbm [thread:$0]  %s53_s24, 16, %s55_s26, [#allocation4]  }
  0x2a   :  { %109 = dma.done.wait [#allocation4], 16  }
  0x2b   :  { %110 = vsyncadd [#allocation4], 4294967280 }
  0x2c   :  { %62 = vsyncpa [#allocation4], 1 }
  0x2d   :  { %63 = vsyncpa [#allocation5], 1 }

</bundles_post_ra>
